<compile_context>
chip_gen: v7x
topology: tpu7x:2x2x1
jax: 0.10.0
libtpu: 0.0.40
codegen_flags: <defaults>
</compile_context>

<pallas_src>
import functools

import jax
import jax.numpy as jnp
from jax.experimental import pallas as pl
from jax.experimental.pallas import tpu as pltpu


def _layernorm_kernel(x_ref, w_ref, b_ref, o_ref, *, eps):
    x = x_ref[...].astype(jnp.float32)               # (tile, H) f32 upcast
    u = jnp.mean(x, axis=-1, keepdims=True)          # mean over hidden (XLU)
    xc = x - u
    s = jnp.mean(xc * xc, axis=-1, keepdims=True)    # biased variance (.pow(2).mean)
    inv = jax.lax.rsqrt(s + eps)                     # eps inside the sqrt (EUP)
    w = w_ref[...]                                   # (1, H) f32, cast hoisted to wrapper
    b = b_ref[...]                                   # (1, H) f32
    o_ref[...] = (w * (xc * inv) + b).astype(o_ref.dtype)


def _pick_row_tile(num_rows, hidden, itemsize):
    """Sublane-aligned row tile sized for the HBM roofline while keeping the
    *full* per-step VMEM footprint (pipeline buffers + in-kernel f32 temps)
    inside every generation's per-core VMEM."""
    # Sub-32-bit dtypes pack along sublanes: keep tiles multiples of the packing.
    sublane = 8 if itemsize >= 4 else (16 if itemsize == 2 else 32)
    row_wire_bytes = max(1, hidden * itemsize)
    row_f32_bytes = max(1, hidden * 4)

    # Per-row footprint per grid step:
    #   2 double-buffered input tiles + 2 double-buffered output tiles (wire dtype)
    #   + ~2 live (row_tile, H) float32 temporaries inside the kernel body.
    bytes_per_row = 4 * row_wire_bytes + 2 * row_f32_bytes
    vmem_budget = 24 * 1024 * 1024          # fits v7x 64 MiB/TC with headroom
    max_rows_by_vmem = max(sublane, vmem_budget // bytes_per_row)

    # Byte-targeted tile: ~2 MiB of wire data per input tile.
    target_tile_bytes = 2 * 1024 * 1024
    tile = max(sublane, target_tile_bytes // row_wire_bytes)
    tile = min(tile, max_rows_by_vmem)

    # Keep >= 4 grid steps when possible so the "parallel" row axis can shard
    # across both v7x TensorCores and the pipeline has work to overlap.
    min_steps = 4
    if num_rows > sublane * min_steps:
        tile = min(tile, max(sublane, -(-num_rows // min_steps)))

    rows_rounded = ((num_rows + sublane - 1) // sublane) * sublane
    tile = min(tile, rows_rounded)
    tile = max(sublane, (tile // sublane) * sublane)
    return int(tile)


def _vmem_limit_bytes(row_tile, hidden, itemsize):
    wire_tile = row_tile * hidden * itemsize
    f32_tile = row_tile * hidden * 4
    pipeline = 4 * wire_tile              # 2 in + 2 out double-buffered tiles
    temps = 2 * f32_tile                  # upcast x and centered xc
    params = 2 * 2 * hidden * 4           # weight + bias (f32), double-buffered
    footprint = pipeline + temps + params
    # 25% headroom + 1 MiB for Mosaic internal scratch; floor at 4 MiB and
    # clamp to 48 MiB so it always fits v7x's 64 MiB physical VMEM per core.
    return int(min(max(footprint * 1.25 + (1 << 20), 4 << 20), 48 * 1024 * 1024))


@functools.lru_cache(maxsize=None)
def _build_layernorm_call(num_rows, hidden, dtype_name, eps, row_tile):
    dtype = jnp.dtype(dtype_name)
    kernel = functools.partial(_layernorm_kernel, eps=eps)
    grid = (pl.cdiv(num_rows, row_tile),)
    return pl.pallas_call(
        kernel,
        out_shape=jax.ShapeDtypeStruct((num_rows, hidden), dtype),
        grid_spec=pltpu.PrefetchScalarGridSpec(
            num_scalar_prefetch=0,
            grid=grid,
            in_specs=[
                pl.BlockSpec((row_tile, hidden), lambda i: (i, 0)),
                pl.BlockSpec((1, hidden), lambda i: (0, 0)),   # weight: resident
                pl.BlockSpec((1, hidden), lambda i: (0, 0)),   # bias:   resident
            ],
            out_specs=pl.BlockSpec((row_tile, hidden), lambda i: (i, 0)),
        ),
        compiler_params=pltpu.CompilerParams(
            dimension_semantics=("parallel",),   # rows shard across TCs on v7x
            vmem_limit_bytes=_vmem_limit_bytes(row_tile, hidden, dtype.itemsize),
        ),
    )


def bert_layer_norm(x, weight, bias, eps=1e-12, row_tile=None):
    """x: (..., H); weight, bias: (H,). Returns same shape/dtype as x."""
    orig_shape = x.shape
    H = orig_shape[-1]
    xr = x.reshape(-1, H)
    R = xr.shape[0]

    if row_tile is None:
        row_tile = _pick_row_tile(R, H, xr.dtype.itemsize)

    # Hoist the affine-parameter upcast out of the per-step kernel body.
    w2 = weight.astype(jnp.float32).reshape(1, H)
    b2 = bias.astype(jnp.float32).reshape(1, H)

    call = _build_layernorm_call(R, H, xr.dtype.name, float(eps), int(row_tile))
    out = call(xr, w2, b2)
    return out.reshape(orig_shape)


def _reference(x, weight, bias, eps=1e-12):
    xf = x.astype(jnp.float32)
    u = jnp.mean(xf, axis=-1, keepdims=True)
    s = jnp.mean((xf - u) ** 2, axis=-1, keepdims=True)
    xn = (xf - u) / jnp.sqrt(s + eps)
    return (weight.astype(jnp.float32) * xn + bias.astype(jnp.float32)).astype(x.dtype)


if __name__ == "__main__":
    key = jax.random.PRNGKey(0)

    # Small smoke test matching the module: (batch, seq, hidden) with default init.
    batch, seq, hidden = 2, 8, 32
    x = jax.random.normal(key, (batch, seq, hidden), dtype=jnp.float32)
    weight = jnp.ones((hidden,), dtype=jnp.float32)   # nn.Parameter(torch.ones)
    bias = jnp.zeros((hidden,), dtype=jnp.float32)    # nn.Parameter(torch.zeros)

    out = bert_layer_norm(x, weight, bias, eps=1e-12)
    out = jax.block_until_ready(out)
    ref = _reference(x, weight, bias, eps=1e-12)
    assert out.shape == x.shape and out.dtype == x.dtype
    assert jnp.allclose(out, ref, atol=1e-5, rtol=1e-5), "mismatch vs reference (aligned)"

    # Ragged row count (21 rows, not a multiple of the tile) + non-trivial affine,
    # exercising the pad-free cdiv grid path.
    k1, k2, k3 = jax.random.split(key, 3)
    x2 = jax.random.normal(k1, (3, 7, hidden), dtype=jnp.float32)
    w2 = jax.random.normal(k2, (hidden,), dtype=jnp.float32)
    b2 = jax.random.normal(k3, (hidden,), dtype=jnp.float32)
    out2 = jax.block_until_ready(bert_layer_norm(x2, w2, b2, eps=1e-12))
    ref2 = _reference(x2, w2, b2, eps=1e-12)
    assert out2.shape == x2.shape and out2.dtype == x2.dtype
    assert jnp.allclose(out2, ref2, atol=1e-5, rtol=1e-5), "mismatch vs reference (ragged)"

    # bf16 wire dtype (sublane-packed tiles, in-kernel f32 upcast path).
    k4, k5, k6 = jax.random.split(k1, 3)
    x3 = jax.random.normal(k4, (4, 16, 128), dtype=jnp.bfloat16)
    w3 = jax.random.normal(k5, (128,), dtype=jnp.float32)
    b3 = jax.random.normal(k6, (128,), dtype=jnp.float32)
    out3 = jax.block_until_ready(bert_layer_norm(x3, w3, b3, eps=1e-12))
    ref3 = _reference(x3, w3, b3, eps=1e-12)
    assert out3.shape == x3.shape and out3.dtype == x3.dtype
    assert jnp.allclose(out3.astype(jnp.float32), ref3.astype(jnp.float32),
                        atol=3e-2, rtol=3e-2), "mismatch vs reference (bf16)"

    print("KERNEL_OK")
</pallas_src>

<mosaic_0001>
module attributes {stable_mosaic.version = 11 : i64} {
  func.func @_layernorm_kernel(%arg0: i32, %arg1: memref<16x32xf32, #tpu.memory_space<vmem>>, %arg2: memref<1x32xf32, #tpu.memory_space<vmem>>, %arg3: memref<1x32xf32, #tpu.memory_space<vmem>>, %arg4: memref<16x32xf32, #tpu.memory_space<vmem>>) attributes {dimension_semantics = [#tpu.dimension_semantics<parallel>], iteration_bounds = array<i64: 1>, scalar_prefetch = 0 : i64, scratch_operands = 0 : i64, tpu.core_type = #tpu.core_type<tc>, window_params = [{transform_indices = @transform_0, window_bounds = array<i64: 16, 32>}, {pipeline_mode = #tpu.pipeline_mode<synchronous>, transform_indices = @transform_1, window_bounds = array<i64: 1, 32>}, {pipeline_mode = #tpu.pipeline_mode<synchronous>, transform_indices = @transform_2, window_bounds = array<i64: 1, 32>}, {transform_indices = @transform_3, window_bounds = array<i64: 16, 32>}]} {
    %c0 = arith.constant 0 : index
    %c0_0 = arith.constant 0 : index
    %0 = vector.load %arg1[%c0, %c0_0] : memref<16x32xf32, #tpu.memory_space<vmem>>, vector<16x32xf32>
    %cst = arith.constant dense<0.000000e+00> : vector<16xf32>
    %1 = vector.multi_reduction <add>, %0, %cst [1] : vector<16x32xf32> to vector<16xf32>
    %2 = vector.shape_cast %1 : vector<16xf32> to vector<16x1xf32>
    %cst_1 = arith.constant 3.200000e+01 : f32
    %3 = vector.broadcast %cst_1 : f32 to vector<16x1xf32>
    %4 = arith.divf %2, %3 : vector<16x1xf32>
    %5 = vector.broadcast %4 : vector<16x1xf32> to vector<16x32xf32>
    %6 = arith.subf %0, %5 : vector<16x32xf32>
    %7 = arith.mulf %6, %6 : vector<16x32xf32>
    %cst_2 = arith.constant dense<0.000000e+00> : vector<16xf32>
    %8 = vector.multi_reduction <add>, %7, %cst_2 [1] : vector<16x32xf32> to vector<16xf32>
    %9 = vector.shape_cast %8 : vector<16xf32> to vector<16x1xf32>
    %cst_3 = arith.constant 3.200000e+01 : f32
    %10 = vector.broadcast %cst_3 : f32 to vector<16x1xf32>
    %11 = arith.divf %9, %10 : vector<16x1xf32>
    %cst_4 = arith.constant 9.99999996E-13 : f32
    %12 = vector.broadcast %cst_4 : f32 to vector<16x1xf32>
    %13 = arith.addf %11, %12 : vector<16x1xf32>
    %14 = math.rsqrt %13 : vector<16x1xf32>
    %c0_5 = arith.constant 0 : index
    %c0_6 = arith.constant 0 : index
    %15 = vector.load %arg2[%c0_5, %c0_6] : memref<1x32xf32, #tpu.memory_space<vmem>>, vector<1x32xf32>
    %c0_7 = arith.constant 0 : index
    %c0_8 = arith.constant 0 : index
    %16 = vector.load %arg3[%c0_7, %c0_8] : memref<1x32xf32, #tpu.memory_space<vmem>>, vector<1x32xf32>
    %17 = vector.broadcast %14 : vector<16x1xf32> to vector<16x32xf32>
    %18 = arith.mulf %6, %17 : vector<16x32xf32>
    %19 = vector.broadcast %15 : vector<1x32xf32> to vector<16x32xf32>
    %20 = arith.mulf %19, %18 : vector<16x32xf32>
    %21 = vector.broadcast %16 : vector<1x32xf32> to vector<16x32xf32>
    %22 = arith.addf %20, %21 : vector<16x32xf32>
    %c0_9 = arith.constant 0 : index
    %c0_10 = arith.constant 0 : index
    %23 = vector.load %arg4[%c0_9, %c0_10] : memref<16x32xf32, #tpu.memory_space<vmem>>, vector<16x32xf32>
    tpu.vector_store %arg4[%c0_9, %c0_10], %22 {strides = array<i32>} : memref<16x32xf32, #tpu.memory_space<vmem>>, vector<16x32xf32>,
    return
  }
  func.func @transform_0(%arg0: i32) -> (i32, i32) {
    %c0_i32 = arith.constant 0 : i32
    %c0_i32_0 = arith.constant 0 : i32
    return %arg0, %c0_i32 : i32, i32
  }
  func.func @transform_1(%arg0: i32) -> (i32, i32) {
    %c0_i32 = arith.constant 0 : i32
    %c0_i32_0 = arith.constant 0 : i32
    %c0_i32_1 = arith.constant 0 : i32
    return %c0_i32, %c0_i32_0 : i32, i32
  }
  func.func @transform_2(%arg0: i32) -> (i32, i32) {
    %c0_i32 = arith.constant 0 : i32
    %c0_i32_0 = arith.constant 0 : i32
    %c0_i32_1 = arith.constant 0 : i32
    return %c0_i32, %c0_i32_0 : i32, i32
  }
  func.func @transform_3(%arg0: i32) -> (i32, i32) {
    %c0_i32 = arith.constant 0 : i32
    %c0_i32_0 = arith.constant 0 : i32
    return %arg0, %c0_i32 : i32, i32
  }
}

</mosaic_0001>

<bundles_post_ra>
// kernel: tpu_custom_call.1
= control target key start
LH: loop header
LB: loop body
LE: loop exit
PB: predicated region body
PF: predicated region fallthrough
CT: control target
= control target key end

     0   :  { %8 = vsyncpa [#allocation3], 0  ;;  %s220_s0 = inlined_call_operand.hbm [shape: f32[16,32], index: 0, kind: input, shape index: {}]   ;;  %s221_s1 = inlined_call_operand.vmem [shape: f32[1,32], index: 1, kind: input, shape index: {}]   ;;  %s222_s2 = inlined_call_operand.vmem [shape: f32[1,32], index: 2, kind: input, shape index: {}]   ;;  %s223_s3 = inlined_call_operand.hbm [shape: f32[16,32], index: 3, kind: output, shape index: {}]  }
   0x1   :  { %9 = vsyncpa [#allocation4], 0  ;;  %s154_s12 = smov [#allocation2]   ;;  %s106_s16 = scalar_lea.hbm %s220_s0, 256 }
   0x2   :  { %s15_s13 = sshll.u32 %s154_s12, 4  ;;  %p107_p0 = scmp.ne.s32.totalorder %s220_s0, %s106_s16  ;;  %s16_s13 = int_to_ptr.vmem [resolvable:$true] %s15_s13 }
   0x3   :  { %p110_p1 = scmp.lt.u32.totalorder %s106_s16, %s220_s0 }
   0x5   :  { %p112_p2 = pnand %p110_p1, %p107_p0 }
   0x7   :  { %115 = shalt.err (!%p112_p2)
}
   0x8   :  { %s116_s21 = scalar_lea.vmem %s16_s13, 256  ;;  %p121_p4 = scmp.lt.s32.totalorder %s16_s13, %s16_s13 }
   0x9   :  { %p117_p3 = scmp.ne.s32.totalorder %s16_s13, %s116_s21  ;;  %p122_p5 = scmp.lt.s32.totalorder %s116_s21, %s116_s21 }
   0xb   :  { %p123_p6 = por %p122_p5, %p121_p4 }
   0xd   :  { %p124_p7 = pnand %p123_p6, %p117_p3 }
   0xf   :  { %127 = shalt.err (!%p124_p7)
}
  0x10   :  { %s155_s22 = smov 128   ;;  %s156_s23 = smov 8  }
  0x11   :  { %21 = dma.hbm_to_vmem [thread:$0]  %s220_s0, 256, %s16_s13, [#allocation3], %s155_s22, %s155_s22, %s156_s23  }
  0x12   :  { %150 = dma.done.wait [#allocation3], 256  }
  0x13   :  { %151 = vsyncadd [#allocation3], 4294967040  ;;  %vm31_vm0 = vcmask 261120   ;;  %v29_v0 = vld [vmem:[#allocation2] sm:$0xff]  ;;  %v30_v1 = vld [vmem:[#allocation2 + $0x8] sm:$0xff]  ;;  %s157_s29 = smov [#allocation5]  }
  0x14   :  { %v32_v2 = vsel %vm31_vm0, %v29_v0, 0.0  ;;  %v35_v3 = vsel %vm31_vm0, %v30_v1, 0.0  ;;  %v96_v21 = vld [vmem:[%s221_s1] ss:$0 sm:$0xff]  ;;  %s84_s30 = sshll.u32 %s157_s29, 4  ;;  %s85_s30 = int_to_ptr.vmem [resolvable:$true] %s84_s30 }
  0x15   :  { %33 = vadd.xlane.f32.xlu0 %v32_v2  ;;  %v97_v23 = vld [vmem:[%s222_s2] ss:$0 sm:$0xff]  ;;  %s128_s4 = scalar_lea.vmem %s85_s30, 256  ;;  %p133_p9 = scmp.lt.s32.totalorder %s85_s30, %s85_s30 }
  0x16   :  { %p129_p8 = scmp.ne.s32.totalorder %s85_s30, %s128_s4  ;;  %p134_p10 = scmp.lt.s32.totalorder %s128_s4, %s128_s4 }
  0x18   :  { %p135_p11 = por %p134_p10, %p133_p9 }
  0x19   :  { %36 = vadd.xlane.f32.xlu0 %v35_v3 }
  0x1a   :  { %p136_p12 = pnand %p135_p11, %p129_p8 }
  0xa2   :  { %v34_v4 = vpop.xlane.xlu0 %33 }
  0xa3   :  { %v39_v5 = vmul.f32 0.03125, %v34_v4 }
  0xa5   :  { %v41_v6 = vsub.f32 %v29_v0, %v39_v5 }
  0xa6   :  { %v37_v7 = vpop.xlane.xlu0 %36 }
  0xa7   :  { %v40_v8 = vmul.f32 0.03125, %v37_v7  ;;  %v43_v9 = vmul.f32 %v41_v6, %v41_v6 }
  0xa9   :  { %v42_v10 = vsub.f32 %v30_v1, %v40_v8  ;;  %v45_v11 = vsel %vm31_vm0, %v43_v9, 0.0 }
  0xaa   :  { %46 = vadd.xlane.f32.xlu1 %v45_v11 }
  0xab   :  { %v44_v12 = vmul.f32 %v42_v10, %v42_v10 }
  0xad   :  { %v48_v13 = vsel %vm31_vm0, %v44_v12, 0.0 }
  0xae   :  { %49 = vadd.xlane.f32.xlu1 %v48_v13 }
 0x137   :  { %v47_v14 = vpop.xlane.xlu1 %46 }
 0x138   :  { %v51_v15 = vmul.f32 0.03125, %v47_v14 }
 0x13a   :  { %v53_v16 = vadd.f32 1e-12, %v51_v15 }
 0x13b   :  { %v50_v17 = vpop.xlane.xlu1 %49 }
 0x13c   :  { %102 = vrsqrt.f32 %v53_v16  ;;  %v52_v18 = vmul.f32 0.03125, %v50_v17 }
 0x13e   :  { %v54_v19 = vadd.f32 1e-12, %v52_v18 }
 0x140   :  { %104 = vrsqrt.f32 %v54_v19 }
 0x146   :  { %v103_v20 = vpop.eup %102 }
 0x147   :  { %v59_v22 = vmul.f32 %v103_v20, %v41_v6 }
 0x149   :  { %v67_v24 = vmul.f32 %v96_v21, %v59_v22 }
 0x14a   :  { %v105_v25 = vpop.eup %104 }
 0x14b   :  { %v60_v26 = vmul.f32 %v105_v25, %v42_v10  ;;  %v75_v27 = vadd.f32 %v97_v23, %v67_v24 }
 0x14d   :  { %v68_v28 = vmul.f32 %v96_v21, %v60_v26  ;;  %77 = vst.msk [vmem:[#allocation5] sm:$0xff] %vm31_vm0, %v75_v27 }
 0x14f   :  { %v76_v29 = vadd.f32 %v97_v23, %v68_v28 }
 0x151   :  { %78 = vst.msk [vmem:[#allocation5 + $0x8] sm:$0xff] %vm31_vm0, %v76_v29 }
 0x152   :  { %139 = shalt.err (!%p136_p12)
}
 0x153   :  { %s140_s5 = scalar_lea.hbm %s223_s3, 256 }
 0x154   :  { %p141_p13 = scmp.ne.s32.totalorder %s223_s3, %s140_s5  ;;  %p144_p0 = scmp.lt.u32.totalorder %s140_s5, %s223_s3 }
 0x156   :  { %p146_p1 = pnand %p144_p0, %p141_p13 }
 0x158   :  { %149 = shalt.err (!%p146_p1)
}
 0x159   :  { %90 = dma.vmem_to_hbm [thread:$0]  %s85_s30, 256, %s223_s3, [#allocation4], %s155_s22, %s155_s22, %s156_s23  }
 0x15a   :  { %152 = dma.done.wait [#allocation4], 256  }
 0x15b   :  { %153 = vsyncadd [#allocation4], 4294967040 }
 0x15c   :  { %94 = vsyncpa [#allocation3], 1 }
 0x15d   :  { %95 = vsyncpa [#allocation4], 1 }

</bundles_post_ra>
